<compile_context>
chip_gen: v5e
topology: v5e:2x2
jax: 0.10.0
libtpu: 0.0.40
codegen_flags: <defaults>
</compile_context>

<pallas_src>
import functools
import math

import jax
import jax.numpy as jnp
from jax import lax
from jax.experimental import pallas as pl
from jax.experimental.pallas import tpu as pltpu


def _round_up(x, n):
    return ((x + n - 1) // n) * n


def _arcface_kernel(x_ref, wt_ref, rnw_ref, label_ref, o_ref, xn_scratch, *,
                    s, cos_m, sin_m, th, mm, easy_margin, mxu_dtype):
    j = pl.program_id(1)          # class-tile index (innermost, "arbitrary")
    tn = o_ref.shape[1]

    # Hoisted: normalize x once per batch tile (x block resident across j).
    @pl.when(j == 0)
    def _():
        xf = x_ref[...].astype(jnp.float32)
        sumsq = jnp.sum(xf * xf, axis=-1, keepdims=True)
        # 1 / max(||x||, 1e-12)   (eps guard moved to the sum-of-squares domain)
        rnx = lax.rsqrt(jnp.maximum(sumsq, 1e-24))
        xn_scratch[...] = (xf * rnx).astype(mxu_dtype)

    # cosine = (x/||x||) @ (W/||W||).T : MXU matmul on the raw W^T tile with
    # f32 accumulation, post-scaled by the precomputed 1/||w_j||.
    acc = lax.dot_general(
        xn_scratch[...], wt_ref[...],
        dimension_numbers=(((1,), (0,)), ((), ())),
        preferred_element_type=jnp.float32,
    )
    cosine = acc * rnw_ref[...]                       # (B, TN) * (1, TN)

    sine = jnp.sqrt(jnp.clip(1.0 - cosine * cosine, 0.0, 1.0))
    phi = cosine * cos_m - sine * sin_m
    if easy_margin:
        phi = jnp.where(cosine > 0.0, phi, cosine)
    else:
        phi = jnp.where(cosine > th, phi, cosine - mm)

    # one-hot select via column iota compared against the label (scatter_ equiv)
    col = lax.broadcasted_iota(jnp.int32, cosine.shape, 1) + j * tn
    o_ref[...] = jnp.where(col == label_ref[...], phi, cosine) * s


def arcface_forward(x, weight, label, *, s=64.0, m=0.5, easy_margin=False,
                    tile_n=512, tile_b=256, mxu_dtype=jnp.bfloat16):
    """x: (B, in_features); weight: (out_features, in_features); label: (B,).
    Returns (B, out_features) float32 ArcFace logits."""
    B, D = x.shape
    C, D2 = weight.shape
    assert D == D2

    cos_m, sin_m = math.cos(m), math.sin(m)
    th, mm = math.cos(math.pi - m), math.sin(math.pi - m) * m

    # ---- tile / padding choices ---------------------------------------------
    tile_n = _round_up(tile_n, 128)
    tile_n = min(tile_n, _round_up(C, 128))
    C_pad = _round_up(C, tile_n)

    if B <= tile_b:
        tile_b = B
        B_pad = B
    else:
        tile_b = _round_up(tile_b, 8)
        B_pad = _round_up(B, tile_b)

    # ---- wrapper-side weight prep -------------------------------------------
    w32 = weight.astype(jnp.float32)
    rnw = lax.rsqrt(jnp.maximum(jnp.sum(w32 * w32, axis=1), 1e-24))   # (C,)
    wt = w32.T.astype(mxu_dtype)                                      # (D, C)
    if C_pad != C:
        wt = jnp.pad(wt, ((0, 0), (0, C_pad - C)))
        rnw = jnp.pad(rnw, (0, C_pad - C))
    rnw = rnw.reshape(1, C_pad)

    xp = x
    label2d = label.reshape(B, 1).astype(jnp.int32)
    if B_pad != B:
        xp = jnp.pad(xp, ((0, B_pad - B), (0, 0)))
        label2d = jnp.pad(label2d, ((0, B_pad - B), (0, 0)))

    grid = (B_pad // tile_b, C_pad // tile_n)

    kernel = functools.partial(
        _arcface_kernel, s=s, cos_m=cos_m, sin_m=sin_m, th=th, mm=mm,
        easy_margin=easy_margin, mxu_dtype=mxu_dtype)

    # ---- VMEM budget (double-buffered blocks + scratch + temporaries) --------
    mxu_bytes = jnp.dtype(mxu_dtype).itemsize
    x_bytes = jnp.dtype(x.dtype).itemsize
    est = (2 * D * tile_n * mxu_bytes        # W^T tile (double buffer)
           + 2 * tile_n * 4                  # 1/||w|| tile
           + 2 * tile_b * tile_n * 4         # output tile (double buffer)
           + 2 * tile_b * D * x_bytes        # x block
           + 2 * tile_b * 4                  # label block
           + tile_b * D * mxu_bytes          # normalized-x scratch
           + 6 * tile_b * tile_n * 4)        # elementwise f32 temporaries
    vmem_limit = int(min(max(2 * est, 32 * 1024 * 1024), 96 * 1024 * 1024))

    out = pl.pallas_call(
        kernel,
        out_shape=jax.ShapeDtypeStruct((B_pad, C_pad), jnp.float32),
        grid_spec=pltpu.PrefetchScalarGridSpec(
            num_scalar_prefetch=0,
            grid=grid,
            in_specs=[
                pl.BlockSpec((tile_b, D), lambda i, j: (i, 0)),      # x
                pl.BlockSpec((D, tile_n), lambda i, j: (0, j)),      # W^T tile
                pl.BlockSpec((1, tile_n), lambda i, j: (0, j)),      # 1/||w||
                pl.BlockSpec((tile_b, 1), lambda i, j: (i, 0)),      # label
            ],
            out_specs=pl.BlockSpec((tile_b, tile_n), lambda i, j: (i, j)),
            scratch_shapes=[pltpu.VMEM((tile_b, D), mxu_dtype)],
        ),
        compiler_params=pltpu.CompilerParams(
            # class axis "arbitrary" so the j==0 x-norm hoist always precedes
            # the tiles that consume it; batch axis "parallel" (megacore-safe).
            dimension_semantics=("parallel", "arbitrary"),
            vmem_limit_bytes=vmem_limit),
    )(xp, wt, rnw, label2d)

    return out[:B, :C]


def _reference(x, weight, label, *, s=64.0, m=0.5, easy_margin=False):
    """Pure-JAX reference mirroring the PyTorch forward (device_id=None)."""
    eps = 1e-12
    xn = x / jnp.maximum(jnp.linalg.norm(x, axis=1, keepdims=True), eps)
    wn = weight / jnp.maximum(jnp.linalg.norm(weight, axis=1, keepdims=True), eps)
    cosine = jnp.matmul(xn, wn.T, precision=lax.Precision.HIGHEST)
    # clip mirrors the kernel's NaN guard; identical for |cosine| <= 1.
    sine = jnp.sqrt(jnp.clip(1.0 - cosine ** 2, 0.0, 1.0))
    cos_m, sin_m = math.cos(m), math.sin(m)
    th, mm = math.cos(math.pi - m), math.sin(math.pi - m) * m
    phi = cosine * cos_m - sine * sin_m
    if easy_margin:
        phi = jnp.where(cosine > 0, phi, cosine)
    else:
        phi = jnp.where(cosine > th, phi, cosine - mm)
    one_hot = jax.nn.one_hot(label, weight.shape[0], dtype=cosine.dtype)
    return (one_hot * phi + (1.0 - one_hot) * cosine) * s


if __name__ == "__main__":
    B = 8
    IN_FEATURES = 32
    OUT_FEATURES = 200   # not a multiple of 128 -> exercises class padding

    key = jax.random.PRNGKey(0)
    kx, kw, kl = jax.random.split(key, 3)

    # Deterministic xavier_uniform_-style init for weight (out, in).
    bound = math.sqrt(6.0 / (IN_FEATURES + OUT_FEATURES))
    weight = jax.random.uniform(
        kw, (OUT_FEATURES, IN_FEATURES), jnp.float32, -bound, bound)

    x = jax.random.normal(kx, (B, IN_FEATURES), jnp.float32)
    label = jax.random.randint(kl, (B,), 0, OUT_FEATURES, jnp.int32)

    ref = _reference(x, weight, label, s=64.0, m=0.5, easy_margin=False)

    # 1) Exact f32 MXU path with a small class tile (two class tiles + padding):
    #    tight correctness check of the kernel logic.
    out_f32 = arcface_forward(x, weight, label, s=64.0, m=0.5,
                              easy_margin=False, tile_n=128,
                              mxu_dtype=jnp.float32)
    out_f32 = jax.block_until_ready(out_f32)
    assert out_f32.shape == (B, OUT_FEATURES)
    assert jnp.allclose(out_f32, ref, atol=2e-2, rtol=1e-3), (
        float(jnp.max(jnp.abs(out_f32 - ref))))

    # 2) Default bf16-MXU fast path (f32 accumulation + f32 epilogue/norms):
    #    looser tolerance on the s-scaled logits.
    out_bf16 = arcface_forward(x, weight, label, s=64.0, m=0.5,
                               easy_margin=False)
    out_bf16 = jax.block_until_ready(out_bf16)
    assert out_bf16.shape == (B, OUT_FEATURES)
    assert jnp.allclose(out_bf16, ref, atol=1.0, rtol=5e-2), (
        float(jnp.max(jnp.abs(out_bf16 - ref))))

    print("KERNEL_OK")
</pallas_src>

<mosaic_0001>
module attributes {stable_mosaic.version = 11 : i64} {
  func.func @_arcface_kernel(%arg0: i32, %arg1: i32, %arg2: memref<8x32xf32, #tpu.memory_space<vmem>>, %arg3: memref<32x128xf32, #tpu.memory_space<vmem>>, %arg4: memref<1x128xf32, #tpu.memory_space<vmem>>, %arg5: memref<8x1xi32, #tpu.memory_space<vmem>>, %arg6: memref<8x128xf32, #tpu.memory_space<vmem>>, %arg7: memref<8x32xf32, #tpu.memory_space<vmem>>) attributes {dimension_semantics = [#tpu.dimension_semantics<parallel>, #tpu.dimension_semantics<arbitrary>], iteration_bounds = array<i64: 1, 2>, scalar_prefetch = 0 : i64, scratch_operands = 1 : i64, tpu.core_type = #tpu.core_type<tc>, window_params = [{transform_indices = @transform_0, window_bounds = array<i64: 8, 32>}, {transform_indices = @transform_1, window_bounds = array<i64: 32, 128>}, {transform_indices = @transform_2, window_bounds = array<i64: 1, 128>}, {transform_indices = @transform_3, window_bounds = array<i64: 8, 1>}, {transform_indices = @transform_4, window_bounds = array<i64: 8, 128>}]} {
    %c0_i32 = arith.constant 0 : i32
    %0 = arith.cmpi eq, %arg1, %c0_i32 : i32
    %1 = arith.extui %0 : i1 to i32
    %c0_i32_0 = arith.constant 0 : i32
    %2 = arith.cmpi ne, %1, %c0_i32_0 : i32
    scf.if %2 {
      %c0_18 = arith.constant 0 : index
      %c0_19 = arith.constant 0 : index
      %38 = vector.load %arg2[%c0_18, %c0_19] : memref<8x32xf32, #tpu.memory_space<vmem>>, vector<8x32xf32>
      %39 = arith.mulf %38, %38 : vector<8x32xf32>
      %cst_20 = arith.constant dense<0.000000e+00> : vector<8xf32>
      %40 = vector.multi_reduction <add>, %39, %cst_20 [1] : vector<8x32xf32> to vector<8xf32>
      %41 = vector.shape_cast %40 : vector<8xf32> to vector<8x1xf32>
      %cst_21 = arith.constant 1.000000e-24 : f32
      %42 = vector.broadcast %cst_21 : f32 to vector<8x1xf32>
      %43 = arith.maximumf %41, %42 : vector<8x1xf32>
      %44 = math.rsqrt %43 : vector<8x1xf32>
      %45 = vector.broadcast %44 : vector<8x1xf32> to vector<8x32xf32>
      %46 = arith.mulf %38, %45 : vector<8x32xf32>
      %c0_22 = arith.constant 0 : index
      %c0_23 = arith.constant 0 : index
      %47 = vector.load %arg7[%c0_22, %c0_23] : memref<8x32xf32, #tpu.memory_space<vmem>>, vector<8x32xf32>
      tpu.vector_store %arg7[%c0_22, %c0_23], %46 {strides = array<i32>} : memref<8x32xf32, #tpu.memory_space<vmem>>, vector<8x32xf32>,
    } else {
    }
    %c0 = arith.constant 0 : index
    %c0_1 = arith.constant 0 : index
    %3 = vector.load %arg7[%c0, %c0_1] : memref<8x32xf32, #tpu.memory_space<vmem>>, vector<8x32xf32>
    %c0_2 = arith.constant 0 : index
    %c0_3 = arith.constant 0 : index
    %4 = vector.load %arg3[%c0_2, %c0_3] : memref<32x128xf32, #tpu.memory_space<vmem>>, vector<32x128xf32>
    %cst = arith.constant dense<0.000000e+00> : vector<8x128xf32>
    %5 = tpu.matmul %3, %4, %cst {dimension_numbers = #tpu.dot_dimension_numbers<[1], [0], [0], [1], [0, 0, 1, 1], [], []>} : vector<8x32xf32>, vector<32x128xf32>, vector<8x128xf32> -> vector<8x128xf32>
    %c0_4 = arith.constant 0 : index
    %c0_5 = arith.constant 0 : index
    %6 = vector.load %arg4[%c0_4, %c0_5] : memref<1x128xf32, #tpu.memory_space<vmem>>, vector<1x128xf32>
    %7 = vector.broadcast %6 : vector<1x128xf32> to vector<8x128xf32>
    %8 = arith.mulf %5, %7 : vector<8x128xf32>
    %9 = arith.mulf %8, %8 : vector<8x128xf32>
    %cst_6 = arith.constant 1.000000e+00 : f32
    %10 = vector.broadcast %cst_6 : f32 to vector<8x128xf32>
    %11 = arith.subf %10, %9 : vector<8x128xf32>
    %cst_7 = arith.constant 0.000000e+00 : f32
    %cst_8 = arith.constant 1.000000e+00 : f32
    %12 = vector.broadcast %cst_7 : f32 to vector<8x128xf32>
    %13 = arith.maximumf %12, %11 : vector<8x128xf32>
    %14 = vector.broadcast %cst_8 : f32 to vector<8x128xf32>
    %15 = arith.minimumf %14, %13 : vector<8x128xf32>
    %16 = math.sqrt %15 : vector<8x128xf32>
    %cst_9 = arith.constant 0.87758255 : f32
    %17 = vector.broadcast %cst_9 : f32 to vector<8x128xf32>
    %18 = arith.mulf %8, %17 : vector<8x128xf32>
    %cst_10 = arith.constant 0.47942555 : f32
    %19 = vector.broadcast %cst_10 : f32 to vector<8x128xf32>
    %20 = arith.mulf %16, %19 : vector<8x128xf32>
    %21 = arith.subf %18, %20 : vector<8x128xf32>
    %cst_11 = arith.constant -0.87758255 : f32
    %22 = vector.broadcast %cst_11 : f32 to vector<8x128xf32>
    %23 = arith.cmpf ogt, %8, %22 : vector<8x128xf32>
    %cst_12 = arith.constant 0.239712775 : f32
    %24 = vector.broadcast %cst_12 : f32 to vector<8x128xf32>
    %25 = arith.subf %8, %24 : vector<8x128xf32>
    %26 = arith.select %23, %21, %25 : vector<8x128xi1>, vector<8x128xf32>
    %27 = tpu.iota {dimensions = array<i32: 1>} : vector<8x128xi32>
    %c128_i32 = arith.constant 128 : i32
    %28 = arith.muli %arg1, %c128_i32 : i32
    %29 = vector.broadcast %28 : i32 to vector<8x128xi32>
    %30 = arith.addi %27, %29 : vector<8x128xi32>
    %c0_13 = arith.constant 0 : index
    %c0_14 = arith.constant 0 : index
    %31 = vector.load %arg5[%c0_13, %c0_14] : memref<8x1xi32, #tpu.memory_space<vmem>>, vector<8x1xi32>
    %32 = vector.broadcast %31 : vector<8x1xi32> to vector<8x128xi32>
    %33 = arith.cmpi eq, %30, %32 : vector<8x128xi32>
    %34 = arith.select %33, %26, %8 : vector<8x128xi1>, vector<8x128xf32>
    %cst_15 = arith.constant 6.400000e+01 : f32
    %35 = vector.broadcast %cst_15 : f32 to vector<8x128xf32>
    %36 = arith.mulf %34, %35 : vector<8x128xf32>
    %c0_16 = arith.constant 0 : index
    %c0_17 = arith.constant 0 : index
    %37 = vector.load %arg6[%c0_16, %c0_17] : memref<8x128xf32, #tpu.memory_space<vmem>>, vector<8x128xf32>
    tpu.vector_store %arg6[%c0_16, %c0_17], %36 {strides = array<i32>} : memref<8x128xf32, #tpu.memory_space<vmem>>, vector<8x128xf32>,
    return
  }
  func.func @transform_0(%arg0: i32, %arg1: i32) -> (i32, i32) {
    %c0_i32 = arith.constant 0 : i32
    %c0_i32_0 = arith.constant 0 : i32
    return %arg0, %c0_i32 : i32, i32
  }
  func.func @transform_1(%arg0: i32, %arg1: i32) -> (i32, i32) {
    %c0_i32 = arith.constant 0 : i32
    %c0_i32_0 = arith.constant 0 : i32
    return %c0_i32, %arg1 : i32, i32
  }
  func.func @transform_2(%arg0: i32, %arg1: i32) -> (i32, i32) {
    %c0_i32 = arith.constant 0 : i32
    %c0_i32_0 = arith.constant 0 : i32
    return %c0_i32, %arg1 : i32, i32
  }
  func.func @transform_3(%arg0: i32, %arg1: i32) -> (i32, i32) {
    %c0_i32 = arith.constant 0 : i32
    %c0_i32_0 = arith.constant 0 : i32
    return %arg0, %c0_i32 : i32, i32
  }
  func.func @transform_4(%arg0: i32, %arg1: i32) -> (i32, i32) {
    %c0_i32 = arith.constant 0 : i32
    return %arg0, %arg1 : i32, i32
  }
}

</mosaic_0001>

<bundles_post_ra>
// kernel: tpu_custom_call.1
= control target key start
LH: loop header
LB: loop body
LE: loop exit
PB: predicated region body
PF: predicated region fallthrough
CT: control target
= control target key end

     0   :  { %s973_s0 = inlined_call_operand.vmem [shape: f32[8,32], index: 0, kind: input, shape index: {}]   ;;  %s974_s1 = inlined_call_operand.hbm [shape: f32[32,256], index: 1, kind: input, shape index: {}]   ;;  %s975_s2 = inlined_call_operand.hbm [shape: f32[1,256], index: 2, kind: input, shape index: {}]   ;;  %s976_s3 = inlined_call_operand.vmem [shape: s32[8,1], index: 3, kind: input, shape index: {}]   ;;  %s977_s4 = inlined_call_operand.hbm [shape: f32[8,256], index: 4, kind: output, shape index: {}]  }
   0x1   :  { %978 = sst [smem:[#allocation12_spill]] %s974_s1 }
   0x2   :  { %9 = vsyncpa [#allocation4], 0 }
   0x3   :  { %11 = vsyncpa [#allocation4 + $0x1], 0 }
   0x4   :  { %12 = vsyncpa [#allocation7], 0 }
   0x5   :  { %14 = vsyncpa [#allocation7 + $0x1], 0 }
   0x6   :  { %15 = vsyncpa [#allocation5], 0 }
   0x7   :  { %17 = vsyncpa [#allocation5 + $0x1], 0  ;;  %s812_s15 = smov 0   ;;  %s814_s16 = smov 0  }
   0x8   :  { %s816_s17 = smov 0   ;;  %s818_s18 = smov 0  }
   0x9   :  { %s820_s19 = smov 0   ;;  %s822_s20 = smov 0  }
   0xa LB: > { %s539_s21 = sadd.s32 4294967295, %s781_s20   ;;  %s540_s22 = sadd.s32 4294967294, %s781_s20   ;;  %s781_s20 = sphi %s822_s20, %s23_s20   ;;  %s777_s19 = sphi %s820_s19, %s989_s19   ;;  %s773_s18 = sphi %s818_s18, %s988_s18   ;;  %s769_s17 = sphi %s816_s17, %s987_s17   ;;  %s765_s16 = sphi %s814_s16, %s986_s16   ;;  %s761_s15 = sphi %s812_s15, %s985_s15  }
   0xb   : > { %s32_s23 = sadd.s32 1, %s777_s19  ;;  %s68_s24 = sadd.s32 1, %s769_s17 }
   0xc   : > { %p33_p0 = scmp.ge.s32.totalorder %s32_s23, 2  ;;  %p75_p1 = scmp.ne.s32.totalorder %s769_s17, %s765_s16 }
   0xd   : > { %p76_p2 = scmp.eq.s32.totalorder %s781_s20, 0  ;;  %p81_p3 = scmp.ne.s32.totalorder %s765_s16, %s761_s15 }
   0xe   : > { %s991_s23 = smov (%p33_p0, %s32_s23), 0  ;;  %p82_p5 = scmp.eq.s32.totalorder %s539_s21, 0 }
   0xf   : > { %p853_p4 = por %p76_p2, %p75_p1  ;;  %s65_s26 = ssub.s32 %s777_s19, %s991_s23 }
  0x10   : > { %p159_p6 = scmp.eq.s32.totalorder %s539_s21, 1  ;;  %p66_p7 = scmp.eq.s32.totalorder %s65_s26, 0 }
  0x11   : > { %p859_p8 = por %p82_p5, %p81_p3  ;;  %p165_p10 = scmp.eq.s32.totalorder %s540_s22, 1 }
  0x12   : > { %p863_p9 = por %p159_p6, %p75_p1  ;;  %p544_p12 = scmp.ge.s32.totalorder %s781_s20, 2 }
  0x13   : > { %s868_s29 = scalar_select %p66_p7, %s769_s17, %s68_s24  }
  0x14   : > { %p870_p11 = por %p165_p10, %p81_p3  ;;  %p575_p13 = scmp.lt.s32.totalorder %s781_s20, 2 }
  0x15   : > { %s199_s5 = sand.u32 1, %s769_s17   ;;  %s546_s7 = sshll.u32 %s777_s19, 3 }
  0x16   : > { %s545_s6 = sshll.u32 %s199_s5, 5  ;;  %s983_s1 = sld [smem:[#allocation12_spill]] }
  0x17   : > { %s203_s11 = scalar_lea.vmem [#allocation3], %s545_s6  ;;  %p883_p0 = pnand %p575_p13, %p853_p4 }
  0x18   : > { %s210_s12 = sshll.u32 %s203_s11, 4  ;;  %s200_s21 = scalar_lea.sflag [#allocation4], %s199_s5  ;;  %s211_s12 = int_to_ptr.vmem [resolvable:$true] %s210_s12 }
  0x19   : > { %s783_s22 = smov 256   ;;  %s784_s24 = smov 128  }
  0x1a   : > { %s785_s26 = smov 8   ;;  %p547_p1 = scmp.ge.s32.totalorder %s781_s20, 1 }
  0x1b   : > { %p235_p2 = scmp.lt.s32.totalorder %s781_s20, 3  ;;  %s226_s8 = scalar_lea.hbm %s975_s2, %s777_s19 }
  0x1c   : > { %s207_s10 = scalar_lea.hbm %s983_s1, %s546_s7  ;;  %s228_s25 = sshll.u32 %s226_s8, 4  ;;  %s229_s25 = int_to_ptr.hbm [resolvable:$true] %s228_s25 }
  0x1d   : > { %s208_s13 = sshll.u32 %s207_s10, 4  ;;  %p236_p3 = pnand %p547_p1, %p235_p2  ;;  %s209_s13 = int_to_ptr.hbm [resolvable:$true] %s208_s13 }
  0x1e   : > { %567 = dma.hbm_to_vmem [thread:$0]  (!%p883_p0), %s209_s13, 512, %s211_s12, %s200_s21, %s783_s22, %s784_s24, %s785_s26  }
  0x1f   : > { %s223_s9 = scalar_lea.vmem [#allocation6], %s199_s5  ;;  %s221_s11 = scalar_lea.sflag [#allocation7], %s199_s5 }
  0x20   : > { %s230_s10 = sshll.u32 %s223_s9, 4  ;;  %239 = sbr.rel (%p236_p3) target bundleno = 366 (0x16e), region = 36  ;;  %s231_s10 = int_to_ptr.vmem [resolvable:$true] %s230_s10 }
  0x21   : > { %570 = dma.hbm_to_vmem [thread:$0]  (!%p883_p0), %s229_s25, 16, %s231_s10, %s221_s11  }
  0x22   : > { %s898_s1 = sand.u32 (!%p236_p3), 1, %s765_s16  }
  0x23   : > { %s548_s12 = sshll.u32 (!%p236_p3), %s898_s1, 5  ;;  %s242_s13 = scalar_lea.sflag (!%p236_p3), [#allocation4], %s898_s1 }
  0x24   : > { %s902_s21 = scalar_lea.vmem (!%p236_p3), [#allocation3], %s548_s12 }
  0x25   : > { %748 = dma.done.wait (%p859_p8), %s242_s13, 512  }
  0x26   : > { %750 = vsyncadd (%p859_p8), %s242_s13, 4294966784  ;;  %s252_s5 = scalar_lea.sflag [#allocation7], %s898_s1  ;;  %s254_s14 = scalar_lea.vmem [#allocation6], %s898_s1 }
  0x27   : > { %752 = dma.done.wait (%p859_p8), %s252_s5, 16  }
  0x28   : > { %754 = vsyncadd (%p859_p8), %s252_s5, 4294967280  ;;  %s549_s22 = sshll.u32 %s898_s1, 3  ;;  %p550_p4 = scmp.ne.s32.totalorder %s773_s18, 0 }
  0x29   : > { %s915_s24 = scalar_lea.vmem [#allocation8], %s549_s22 }
  0x2a   : > { %303 = sbr.rel (%p550_p4) target bundleno = 190 (0xbe), region = 48 }
  0x2f   : > { %v304_v0 = vld [vmem:[%s973_s0] sm:$0xff]  ;;  %vm306_vm0 = vcmask 261120  }
  0x30   : > { %v305_v1 = vmul.f32 %v304_v0, %v304_v0 }
  0x32   : > { %v307_v2 = vsel %vm306_vm0, %v305_v1, 0.0 }
  0x33   : > { %308 = vadd.xlane.f32.xlu0 %v307_v2 }
  0xa6   : > { %v309_v3 = vpop.xlane.xlu0 %308 }
  0xa7   : > { %v310_v4 = vmax.f32 %v309_v3, 1e-24 }
  0xa9   : > { %629 = vrsqrt.f32 %v310_v4  ;;  %vm317_vm2 = vweird.f32 %v310_v4 }
  0xaf   : > { %v630_v5 = vpop.eup %629 }
  0xb0   : > { %v312_v6 = vmul.f32 %v630_v5, %v310_v4  ;;  %vm318_vm1 = vweird.f32 %v630_v5 }
  0xb1   : > { %vm319_vm3 = vmor %vm317_vm2, %vm318_vm1 }
  0xb2   : > { %v313_v7 = vmul.f32 %v630_v5, %v312_v6 }
  0xb4   : > { %v314_v8 = vmul.f32 0.5, %v313_v7 }
  0xb6   : > { %v315_v9 = vsub.f32 1.5, %v314_v8 }
  0xb8   : > { %v316_v10 = vmul.f32 %v630_v5, %v315_v9 }
  0xba   : > { %v320_v11 = vsel %vm319_vm3, %v630_v5, %v316_v10 }
  0xbb   : > { %v321_v12 = vmul.f32 %v320_v11, %v304_v0 }
  0xbd   : > { %322 = vst.msk [vmem:[#allocation2] sm:$0xff] %vm306_vm0, %v321_v12 }
  0xbe PF: > { %v327_v13 = vld [vmem:[%s902_s21 + $0x18] sm:$0xff]  ;;  %v326_v14 = vld [vmem:[%s902_s21 + $0x10] sm:$0xff]  ;;  %v786_v15 = vmov 0   ;;  %v325_v17 = vld [vmem:[%s902_s21 + $0x8] sm:$0xff]  ;;  %vm328_vm4 = vcmask 261120   ;;  %v379_v31 = vlaneseq  ;;  %s553_s8 = sshll.u32 %s773_s18, 7 }
  0xbf   : > { %344 = vmatpush.msra.mxu0 %v327_v13  ;;  %631 = vset.pattern.permute.xlu0 %v786_v15  ;;  %v384_v16 = vld [vmem:[%s976_s3] sm:$0xff]  ;;  %v324_v18 = vld [vmem:[%s902_s21] sm:$0xff]  ;;  %v382_v35 = vstv %s553_s8  ;;  %s555_s25 = sshll.u32 %s773_s18, 3  ;;  %s407_s12 = sshll.u32 %s915_s24, 4  ;;  %s408_s12 = int_to_ptr.vmem [resolvable:$true] %s407_s12 }
  0xc0   : > { %386 = vperm.xlu0 %631, %v384_v16   ;;  %v632_v20 = vld [vmem:[%s254_s14] ss:$0 sm:$0xff]  ;;  %v380_v34 = vand.u32 127, %v379_v31  ;;  %s405_s11 = scalar_lea.hbm %s977_s4, %s555_s25  ;;  %s393_s13 = scalar_lea.sflag [#allocation5], %s898_s1 }
  0xc1   : > { %345 = vmatpush.msra.mxu0 %v326_v14  ;;  %s409_s18 = sshll.u32 %s405_s11, 4  ;;  %s715_s26 = scalar_lea.hbm %s977_s4, 16  ;;  %s410_s18 = int_to_ptr.hbm [resolvable:$true] %s409_s18 }
  0xc2   : > { %v383_v39 = vadd.s32 %v382_v35, %v380_v34  ;;  %s709_s21 = sshra.s32 %s410_s18, 4  ;;  %s710_s21 = int_to_ptr.hbm [resolvable:$true] %s709_s21 }
  0xc3   : > { %346 = vmatpush.msra.mxu0 %v325_v17  ;;  %s711_s5 = scalar_lea.hbm %s710_s21, 8  ;;  %p716_p8 = scmp.lt.s32.totalorder %s710_s21, %s977_s4 }
  0xc4   : > { %v323_v19 = vld [vmem:[#allocation2] sm:$0xff]  ;;  %p712_p5 = scmp.ne.s32.totalorder %s710_s21, %s711_s5  ;;  %p717_p10 = scmp.lt.s32.totalorder %s715_s26, %s711_s5 }
  0xc5   : > { %347 = vmatpush.msra.mxu0 %v324_v18 }
  0xc6   : > { %551 = vmatmul.msk.f32.vlgmr.msra.gmra.mxu0 %vm328_vm4, %v323_v19  ;;  %p713_p6 = pnand %p712_p5, %p863_p9  ;;  %p718_p13 = por %p717_p10, %p716_p8 }
  0xc8   : > { %p714_p7 = pneg %p713_p6 }
  0xca   : > { %p719_p0 = pnand %p718_p13, %p714_p7 }
 0x132   : > { %v387_v40 = vpop.permute.xlu0 %386 }
 0x133   : > { %vm388_vm7 = vcmp.eq.s32.totalorder %v383_v39, %v387_v40 }
 0x143   : > { %v349_v21 = vpop.f32.mrf.mxu0 }
 0x144   : > { %v356_v22 = vmul.f32 %v632_v20, %v349_v21 }
 0x146   : > { %v357_v23 = vmul.f32 %v356_v22, %v356_v22  ;;  %v373_v42 = vmul.f32 0.87758255, %v356_v22  ;;  %v552_v45 = vadd.f32 -0.23971277, %v356_v22  ;;  %vm376_vm8 = vcmp.gt.f32.partialorder %v356_v22, -0.87758255 }
 0x148   : > { %v358_v24 = vsub.f32 1.0, %v357_v23 }
 0x14a   : > { %v359_v25 = vmax.f32 %v358_v24, 0.0 }
 0x14c   : > { %v360_v26 = vmin.f32 %v359_v25, 1.0 }
 0x14e   : > { %633 = vrsqrt.f32 %v360_v26  ;;  %vm368_vm5 = vcmp.eq.f32.partialorder %v360_v26, inf  ;;  %v371_v37 = vand.u32 2147483648, %v360_v26  ;;  %vm370_vm6 = vcmp.eq.f32.partialorder %v360_v26, 0.0 }
 0x154   : > { %v634_v27 = vpop.eup %633 }
 0x155   : > { %v362_v28 = vmul.f32 %v634_v27, %v360_v26 }
 0x157   : > { %v363_v29 = vmul.f32 %v634_v27, %v362_v28 }
 0x159   : > { %v364_v30 = vmul.f32 0.5, %v363_v29 }
 0x15b   : > { %v365_v32 = vsub.f32 1.5, %v364_v30 }
 0x15d   : > { %v366_v33 = vmul.f32 %v634_v27, %v365_v32 }
 0x15f   : > { %v367_v36 = vmul.f32 %v366_v33, %v360_v26 }
 0x161   : > { %v369_v38 = vsel %vm368_vm5, %v360_v26, %v367_v36 }
 0x162   : > { %v372_v41 = vsel %vm370_vm6, %v371_v37, %v369_v38 }
 0x163   : > { %v374_v43 = vmul.f32 0.47942555, %v372_v41 }
 0x165   : > { %v375_v44 = vsub.f32 %v373_v42, %v374_v43 }
 0x167   : > { %v378_v46 = vsel %vm376_vm8, %v375_v44, %v552_v45 }
 0x168   : > { %v389_v47 = vsel %vm388_vm7, %v378_v46, %v356_v22 }
 0x169   : > { %v390_v48 = vmul.f32 64.0, %v389_v47 }
 0x16b   : > { %391 = vst [vmem:[%s915_s24] sm:$0xff] %v390_v48 }
 0x16c   : > { %722 = shalt.err (!%p719_p0)
}
 0x16d   : > { %562 = dma.vmem_to_hbm [thread:$0]  (%p863_p9), %s408_s12, 128, %s410_s18, %s393_s13  }
 0x16e PF: > { %s421_s1 = sand.u32 1, %s761_s15   ;;  %p572_p1 = pnand %p544_p12, %p870_p11 }
 0x16f   : > { %s422_s24 = scalar_lea.sflag [#allocation5], %s421_s1 }
 0x170   : > { %p573_p2 = pneg %p572_p1 }
 0x172   : > { %756 = dma.done.wait (%p573_p2), %s422_s24, 128  }
 0x173   : > { %758 = vsyncadd (%p573_p2), %s422_s24, 4294967168  ;;  %s23_s20 = sadd.s32 1, %s781_s20   ;;  %s985_s15 = smov %s765_s16 }
 0x174   : > { %p20_p3 = scmp.ge.s32.totalorder %s23_s20, 4   ;;  %s986_s16 = smov %s769_s17 }
 0x175   : > { %s987_s17 = smov %s868_s29  ;;  %s988_s18 = smov %s777_s19 }
 0x176   : > { %s989_s19 = smov %s991_s23  ;;  %22 = sbr.rel (!%p20_p3) target bundleno = 10 (0xa), region = 104 }
 0x17b   :  { %428 = vsyncpa [#allocation4], 1 }
 0x17c   :  { %430 = vsyncpa [#allocation4 + $0x1], 1 }
 0x17d   :  { %431 = vsyncpa [#allocation7], 1 }
 0x17e   :  { %433 = vsyncpa [#allocation7 + $0x1], 1 }
 0x17f   :  { %434 = vsyncpa [#allocation5], 1 }
 0x180   :  { %436 = vsyncpa [#allocation5 + $0x1], 1 }

</bundles_post_ra>
